<compile_context>
chip_gen: v5e
topology: v5e:2x2
jax: 0.10.0
libtpu: 0.0.40
codegen_flags: <defaults>
</compile_context>

<pallas_src>
import functools

import jax
import jax.numpy as jnp
from jax import lax
from jax.experimental import pallas as pl
from jax.experimental.pallas import tpu as pltpu


# ----------------------------- helpers -------------------------------------

def _apply_act(y, act):
    if act == "relu":
        return jnp.maximum(y, 0.0)
    if act == "hswish":  # x * relu6(x + 3) / 6  (torch.nn.Hardswish)
        return y * jnp.clip(y + 3.0, 0.0, 6.0) * (1.0 / 6.0)
    return y


def _round_up(n, m):
    return ((n + m - 1) // m) * m


def _pick_tile(n, target, align):
    """Largest divisor of n that is <= target and a multiple of `align` (else n)."""
    if n <= target:
        return n
    for d in range(target, 0, -1):
        if n % d == 0 and d % align == 0:
            return d
    return n


def _pick_strip(H, W, max_elems=128):
    """Largest row-strip RS dividing H with RS*W <= max_elems (>=1)."""
    best = 1
    for r in range(1, H + 1):
        if H % r == 0 and r * W <= max_elems:
            best = r
    return best


def _cparams(semantics):
    return pltpu.CompilerParams(
        dimension_semantics=semantics,
        # 64 MiB: fits v7x physical VMEM exactly, leaves room on v5e/v6e (128 MiB)
        vmem_limit_bytes=64 * 1024 * 1024,
    )


# ----------------------------- Pallas kernels ------------------------------

def _matmul_kernel_1k(x_ref, w_ref, b_ref, o_ref, *, act):
    """Single-K-step matmul (no accumulator scratch / pl.when overhead)."""
    y = jnp.dot(x_ref[...], w_ref[...], preferred_element_type=jnp.float32) + b_ref[...]
    o_ref[...] = _apply_act(y, act).astype(o_ref.dtype)


def _matmul_kernel(x_ref, w_ref, b_ref, o_ref, acc_ref, *, act, nk):
    """Tiled (M,K)x(K,N) matmul + bias + activation with f32 VMEM accumulator."""
    @pl.when(pl.program_id(2) == 0)
    def _():
        acc_ref[...] = jnp.zeros_like(acc_ref)

    acc_ref[...] += jnp.dot(x_ref[...], w_ref[...],
                            preferred_element_type=jnp.float32)

    @pl.when(pl.program_id(2) == nk - 1)
    def _():
        y = acc_ref[...] + b_ref[...]
        o_ref[...] = _apply_act(y, act).astype(o_ref.dtype)


def _dw_agg_kernel(qkv_ref, w_ref, o_ref, pad_ref, *, H, W, RS):
    """Depthwise 5x5 'same' conv (stride 1, no bias/act), one batch element.

    bf16 halo scratch with the interior at sublane offset 8 (aligned stores);
    only the halo border is zeroed; accumulation per RS-row strip in f32.
    """
    ksz = 5
    C = o_ref.shape[-1]
    # zero only the halo border (rows 0..1 / H+2..H+3, cols 0..7 / 8+W..15+W)
    zr = jnp.zeros((2, W + 16, C), pad_ref.dtype)
    pad_ref[0:2] = zr
    pad_ref[H + 2:H + 4] = zr
    zc = jnp.zeros((H + 4, 8, C), pad_ref.dtype)
    pad_ref[:, 0:8, :] = zc
    pad_ref[:, 8 + W:16 + W, :] = zc
    # interior: rows [2, 2+H), cols [8, 8+W)
    pad_ref[2:2 + H, 8:8 + W, :] = qkv_ref[0]

    nstrips = H // RS

    def strip(s, carry):
        r0 = s * RS
        acc = jnp.zeros((RS, W, C), jnp.float32)
        for di in range(ksz):
            for dj in range(ksz):
                sl = pad_ref[pl.ds(r0 + di, RS), (6 + dj):(6 + dj + W), :]
                acc = acc + sl.astype(jnp.float32) * w_ref[di * ksz + dj]
        o_ref[0, pl.ds(r0, RS)] = acc.astype(o_ref.dtype)
        return carry

    lax.fori_loop(0, nstrips, strip, 0, unroll=nstrips <= 8)


def _mla_proj_kernel(qkv_ref, agg_ref, wgd_ref, wp_ref, bp_ref, xres_ref,
                     o_ref, aggv_ref, *, heads, dim, eps):
    """Fused LiteMLA for one batch element:
    grouped 1x1 (block-diagonal matmul) + ReLU linear attention (ksum folded into the
    kv matmul via a ones column) + proj 1x1 (folded BN) + identity residual.
    Per-group contributions are projected and accumulated directly into o_ref."""
    HW = o_ref.shape[1]

    # grouped 1x1 conv on the aggregation branch as one block-diagonal matmul
    aggv_ref[...] = jnp.dot(agg_ref[0], wgd_ref[...],
                            preferred_element_type=jnp.float32).astype(aggv_ref.dtype)

    # init output block with identity residual + folded-BN bias of the proj conv
    o_ref[0] = xres_ref[0] + bp_ref[...]

    ones = jnp.ones((HW, 1), jnp.bfloat16)
    for g in range(2 * heads):
        h = g % heads
        off = 3 * dim * h
        if g < heads:                                      # groups from the qkv conv
            q = qkv_ref[0, :, off:off + dim]
            k = qkv_ref[0, :, off + dim:off + 2 * dim]
            v = qkv_ref[0, :, off + 2 * dim:off + 3 * dim]
        else:                                              # groups from the aggreg branch
            q = aggv_ref[:, off:off + dim]
            k = aggv_ref[:, off + dim:off + 2 * dim]
            v = aggv_ref[:, off + 2 * dim:off + 3 * dim]
        q = jnp.maximum(q, 0).astype(jnp.bfloat16)         # kernel_func = relu
        k = jnp.maximum(k, 0).astype(jnp.bfloat16)
        v1 = jnp.concatenate([v.astype(jnp.bfloat16), ones], axis=-1)   # (HW, dim+1)
        # kv and ksum in ONE MXU op: k^T @ [v, 1] -> (dim, dim+1)
        kv = lax.dot_general(k, v1, (((0,), (0,)), ((), ())),
                             preferred_element_type=jnp.float32)
        nd = jnp.dot(q, kv.astype(jnp.bfloat16),
                     preferred_element_type=jnp.float32)                # (HW, dim+1)
        # NOTE: approx reciprocal (~2^-12 rel err); use approx=False for strict parity.
        att = nd[:, :dim] * pl.reciprocal(nd[:, dim:] + eps, approx=True)
        o_ref[0] += jnp.dot(att.astype(jnp.bfloat16),
                            wp_ref[g * dim:(g + 1) * dim, :],
                            preferred_element_type=jnp.float32)


def _mbconv_kernel(x_ref, wi_ref, bi_ref, wd_ref, bd_ref, wp_ref, bp_ref,
                   o_ref, mid_ref, *, H, W, RS):
    """Fused MBConv (one batch element): inverted 1x1 (bias, hswish) -> dw3x3
    (bias, hswish) -> point 1x1 (folded BN) -> + identity residual.
    The expand_ratio*C 'mid' activation stays in VMEM (bf16 halo scratch)."""
    Dm = mid_ref.shape[-1]
    HW = H * W

    # 1) inverted 1x1 as a single (HW, C) x (C, mid) MXU matmul, bf16 operands / f32 acc
    m = jnp.dot(x_ref[0].astype(jnp.bfloat16), wi_ref[...],
                preferred_element_type=jnp.float32) + bi_ref[...]
    m = _apply_act(m, "hswish").astype(mid_ref.dtype)                   # (HW, Dm)

    # 2) store into the halo scratch; interior at rows [1,1+H), sublane cols [8, 8+W)
    zr = jnp.zeros((1, W + 16, Dm), mid_ref.dtype)
    mid_ref[0:1] = zr
    mid_ref[H + 1:H + 2] = zr
    zc = jnp.zeros((H + 2, 8, Dm), mid_ref.dtype)
    mid_ref[:, 0:8, :] = zc
    mid_ref[:, 8 + W:16 + W, :] = zc
    mid_ref[1:1 + H, 8:8 + W, :] = m.reshape(H, W, Dm)

    # 3) dw3x3 + hswish + point 1x1 + residual, per RS-row strip (strip M = RS*W rows)
    wp = wp_ref[...]
    bp = bp_ref[...]
    bd = bd_ref[...]
    nstrips = H // RS

    def strip(s, carry):
        r0 = s * RS
        acc = jnp.zeros((RS, W, Dm), jnp.float32)
        for di in range(3):
            for dj in range(3):
                sl = mid_ref[pl.ds(r0 + di, RS), (7 + dj):(7 + dj + W), :]
                acc = acc + sl.astype(jnp.float32) * wd_ref[di * 3 + dj]
        a = _apply_act(acc + bd, "hswish").astype(jnp.bfloat16).reshape(RS * W, Dm)
        y = jnp.dot(a, wp, preferred_element_type=jnp.float32) + bp     # (RS*W, C)
        row = r0 * W
        o_ref[0, pl.ds(row, RS * W), :] = y + x_ref[0, pl.ds(row, RS * W), :]
        return carry

    lax.fori_loop(0, nstrips, strip, 0, unroll=nstrips <= 8)


# ----------------------------- Pallas wrappers ------------------------------

def matmul_bias_act(x2d, w, b, act="none", out_dtype=jnp.bfloat16,
                    tm=512, tn=256, tk=512):
    M, K = x2d.shape
    _, N = w.shape
    tm = _pick_tile(M, tm, 8)
    tn = _pick_tile(N, tn, 128)
    tk = _pick_tile(K, tk, 128)
    gm, gn, gk = M // tm, N // tn, K // tk
    b2 = b.reshape(1, N).astype(jnp.float32)

    if gk == 1:  # single K step: no accumulator scratch, no pl.when overhead
        return pl.pallas_call(
            functools.partial(_matmul_kernel_1k, act=act),
            out_shape=jax.ShapeDtypeStruct((M, N), out_dtype),
            grid=(gm, gn),
            in_specs=[
                pl.BlockSpec((tm, K), lambda i, j: (i, 0)),
                pl.BlockSpec((K, tn), lambda i, j: (0, j)),
                pl.BlockSpec((1, tn), lambda i, j: (0, j)),
            ],
            out_specs=pl.BlockSpec((tm, tn), lambda i, j: (i, j)),
            compiler_params=_cparams(("parallel", "parallel")),
        )(x2d, w, b2)

    return pl.pallas_call(
        functools.partial(_matmul_kernel, act=act, nk=gk),
        out_shape=jax.ShapeDtypeStruct((M, N), out_dtype),
        grid=(gm, gn, gk),
        in_specs=[
            pl.BlockSpec((tm, tk), lambda i, j, kk: (i, kk)),
            pl.BlockSpec((tk, tn), lambda i, j, kk: (kk, j)),
            pl.BlockSpec((1, tn), lambda i, j, kk: (0, j)),
        ],
        out_specs=pl.BlockSpec((tm, tn), lambda i, j, kk: (i, j)),
        scratch_shapes=[pltpu.VMEM((tm, tn), jnp.float32)],
        compiler_params=_cparams(("parallel", "parallel", "arbitrary")),
    )(x2d, w, b2)


def dw_agg_5x5(qkv, w_taps, out_dtype=jnp.bfloat16):
    B, H, W, C = qkv.shape
    RS = _pick_strip(H, W, 128)
    return pl.pallas_call(
        functools.partial(_dw_agg_kernel, H=H, W=W, RS=RS),
        out_shape=jax.ShapeDtypeStruct((B, H, W, C), out_dtype),
        grid=(B,),
        in_specs=[
            pl.BlockSpec((1, H, W, C), lambda b: (b, 0, 0, 0)),
            pl.BlockSpec((25, C), lambda b: (0, 0)),
        ],
        out_specs=pl.BlockSpec((1, H, W, C), lambda b: (b, 0, 0, 0)),
        scratch_shapes=[pltpu.VMEM((H + 4, W + 16, C), jnp.bfloat16)],
        compiler_params=_cparams(("parallel",)),
    )(qkv, w_taps)


def lite_mla_proj(qkv3d, agg3d, w_gd, w_proj, b_proj, xres3d, heads, dim, eps):
    B, HW, C3p = qkv3d.shape
    T2, Cp = w_proj.shape
    return pl.pallas_call(
        functools.partial(_mla_proj_kernel, heads=heads, dim=dim, eps=eps),
        out_shape=jax.ShapeDtypeStruct((B, HW, Cp), jnp.float32),
        grid=(B,),
        in_specs=[
            pl.BlockSpec((1, HW, C3p), lambda b: (b, 0, 0)),
            pl.BlockSpec((1, HW, C3p), lambda b: (b, 0, 0)),
            pl.BlockSpec((C3p, C3p), lambda b: (0, 0)),
            pl.BlockSpec((T2, Cp), lambda b: (0, 0)),
            pl.BlockSpec((1, Cp), lambda b: (0, 0)),
            pl.BlockSpec((1, HW, Cp), lambda b: (b, 0, 0)),
        ],
        out_specs=pl.BlockSpec((1, HW, Cp), lambda b: (b, 0, 0)),
        scratch_shapes=[pltpu.VMEM((HW, C3p), jnp.bfloat16)],
        compiler_params=_cparams(("parallel",)),
    )(qkv3d, agg3d, w_gd, w_proj, b_proj.reshape(1, Cp), xres3d)


def mbconv_fused(x1, w_inv, b_inv, w_dw3, b_dw3, w_pt, b_pt, H, W):
    B, HW, Cp = x1.shape
    Dm = w_inv.shape[1]
    RS = _pick_strip(H, W, 128)
    return pl.pallas_call(
        functools.partial(_mbconv_kernel, H=H, W=W, RS=RS),
        out_shape=jax.ShapeDtypeStruct((B, HW, Cp), jnp.float32),
        grid=(B,),
        in_specs=[
            pl.BlockSpec((1, HW, Cp), lambda b: (b, 0, 0)),
            pl.BlockSpec((Cp, Dm), lambda b: (0, 0)),
            pl.BlockSpec((1, Dm), lambda b: (0, 0)),
            pl.BlockSpec((9, Dm), lambda b: (0, 0)),
            pl.BlockSpec((1, Dm), lambda b: (0, 0)),
            pl.BlockSpec((Dm, Cp), lambda b: (0, 0)),
            pl.BlockSpec((1, Cp), lambda b: (0, 0)),
        ],
        out_specs=pl.BlockSpec((1, HW, Cp), lambda b: (b, 0, 0)),
        scratch_shapes=[pltpu.VMEM((H + 2, W + 16, Dm), jnp.bfloat16)],
        compiler_params=_cparams(("parallel",)),
    )(x1, w_inv, b_inv.reshape(1, Dm), w_dw3, b_dw3.reshape(1, Dm),
      w_pt, b_pt.reshape(1, Cp))


# ----------------------------- parameters -----------------------------------

def init_params(key, C, dim, expand_ratio=4, lane=128):
    heads = C // dim                      # heads_ratio = 1.0
    T = heads * dim                       # total_dim
    C3 = 3 * T
    mid = int(round(C * expand_ratio))    # MBConv mid channels
    Cp = _round_up(C, lane)               # lane-padded widths (dense vst stores)
    C3p = _round_up(C3, lane)
    Dm = _round_up(mid, lane)
    keys = iter(jax.random.split(key, 32 + 3 * heads))

    def rnd(shape, scale=0.1):
        return scale * jax.random.normal(next(keys), shape, jnp.float32)

    def fold_bn(w):
        # eval-mode BatchNorm2d folded into (w, b); eps = 1e-5 (PyTorch default)
        Cout = w.shape[-1]
        gamma = 1.0 + rnd((Cout,))
        beta = rnd((Cout,))
        mean = rnd((Cout,))
        var = 1.0 + jnp.abs(rnd((Cout,)))
        scale = gamma / jnp.sqrt(var + 1e-5)
        return w * scale[None, :], beta - mean * scale

    def pad2(w, r, c):
        return jnp.pad(w, ((0, r - w.shape[0]), (0, c - w.shape[1])))

    def pad1(b, n):
        return jnp.pad(b, (0, n - b.shape[0]))

    p = {"heads": heads, "dim": dim, "Cp": Cp, "C3p": C3p, "Dm": Dm}

    # --- LiteMLA ---
    p["w_qkv"] = pad2(rnd((C, C3)), Cp, C3p).astype(jnp.bfloat16)   # 1x1, no bias/norm/act
    p["b_qkv"] = jnp.zeros((C3p,), jnp.float32)
    p["w_dw5"] = pad2(rnd((25, C3)), 25, C3p)                       # dw 5x5 taps (f32, VPU)
    wgd = jnp.zeros((C3, C3), jnp.float32)                          # grouped 1x1 -> block-diag
    for c in range(3 * heads):
        wgd = wgd.at[c * dim:(c + 1) * dim, c * dim:(c + 1) * dim].set(rnd((dim, dim)))
    p["w_gd"] = pad2(wgd, C3p, C3p).astype(jnp.bfloat16)
    w_proj, b_proj = fold_bn(rnd((2 * T, C)))                       # proj 1x1 + bn2d folded
    p["w_proj"] = pad2(w_proj, 2 * T, Cp).astype(jnp.bfloat16)
    p["b_proj"] = pad1(b_proj, Cp)

    # --- MBConv ---
    p["w_inv"] = pad2(rnd((C, mid)), Cp, Dm).astype(jnp.bfloat16)   # 1x1, bias, hswish
    p["b_inv"] = pad1(rnd((mid,)), Dm)
    p["w_dw3"] = pad2(rnd((9, mid)), 9, Dm)                         # dw 3x3, bias, hswish
    p["b_dw3"] = pad1(rnd((mid,)), Dm)
    w_pt, b_pt = fold_bn(rnd((mid, C)))                             # 1x1, bn2d, no act
    p["w_pt"] = pad2(w_pt, Dm, Cp).astype(jnp.bfloat16)
    p["b_pt"] = pad1(b_pt, Cp)
    return p


# ----------------------------- forward --------------------------------------

def efficient_vit_block(x_nchw, p, eps=1e-15):
    B, C, H, W = x_nchw.shape
    dim, heads = p["dim"], p["heads"]
    Cp, C3p = p["Cp"], p["C3p"]
    HW = H * W

    x = jnp.transpose(x_nchw, (0, 2, 3, 1)).astype(jnp.float32)     # NCHW -> NHWC
    if Cp != C:
        x = jnp.pad(x, ((0, 0), (0, 0), (0, 0), (0, Cp - C)))       # lane-pad channels
    x_bf = x.astype(jnp.bfloat16)

    # ---- context module: LiteMLA + identity residual ----
    qkv2d = matmul_bias_act(x_bf.reshape(B * HW, Cp), p["w_qkv"], p["b_qkv"],
                            act="none", out_dtype=jnp.bfloat16)      # (B*HW, C3p)
    qkv4d = qkv2d.reshape(B, H, W, C3p)
    agg4d = dw_agg_5x5(qkv4d, p["w_dw5"])                            # dw 5x5, no bias/act
    x1 = lite_mla_proj(qkv2d.reshape(B, HW, C3p),
                       agg4d.reshape(B, HW, C3p),
                       p["w_gd"], p["w_proj"], p["b_proj"],
                       x.reshape(B, HW, Cp),
                       heads, dim, eps)                              # (B, HW, Cp) f32

    # ---- local module: fused MBConv + identity residual ----
    x2 = mbconv_fused(x1, p["w_inv"], p["b_inv"], p["w_dw3"], p["b_dw3"],
                      p["w_pt"], p["b_pt"], H, W)                    # (B, HW, Cp) f32

    x2 = x2.reshape(B, H, W, Cp)[..., :C]                            # drop lane padding
    return jnp.transpose(x2, (0, 3, 1, 2))                           # NHWC -> NCHW


# ----------------------------- main ------------------------------------------

if __name__ == "__main__":
    key = jax.random.PRNGKey(0)
    kx, kp = jax.random.split(key)

    B, C, H, W = 2, 16, 16, 16   # dim=8 -> heads=2, total_dim=16, mid=64
    dim = 8
    x = jax.random.normal(kx, (B, C, H, W), jnp.float32)
    params = init_params(kp, C, dim, expand_ratio=4)

    out = efficient_vit_block(x, params)
    out = jax.block_until_ready(out)
    assert out.shape == (B, C, H, W) and out.dtype == jnp.float32
    assert bool(jnp.all(jnp.isfinite(out)))
    print("KERNEL_OK")
</pallas_src>

<mosaic_0001>
module attributes {stable_mosaic.version = 11 : i64} {
  func.func @_matmul_kernel_1k(%arg0: i32, %arg1: i32, %arg2: memref<512x128xbf16, #tpu.memory_space<vmem>>, %arg3: memref<128x128xbf16, #tpu.memory_space<vmem>>, %arg4: memref<1x128xf32, #tpu.memory_space<vmem>>, %arg5: memref<512x128xbf16, #tpu.memory_space<vmem>>) attributes {dimension_semantics = [#tpu.dimension_semantics<parallel>, #tpu.dimension_semantics<parallel>], iteration_bounds = array<i64: 1, 1>, scalar_prefetch = 0 : i64, scratch_operands = 0 : i64, tpu.core_type = #tpu.core_type<tc>, window_params = [{transform_indices = @transform_0, window_bounds = array<i64: 512, 128>}, {transform_indices = @transform_1, window_bounds = array<i64: 128, 128>}, {transform_indices = @transform_2, window_bounds = array<i64: 1, 128>}, {transform_indices = @transform_3, window_bounds = array<i64: 512, 128>}]} {
    %c0 = arith.constant 0 : index
    %c0_0 = arith.constant 0 : index
    %0 = vector.load %arg2[%c0, %c0_0] : memref<512x128xbf16, #tpu.memory_space<vmem>>, vector<512x128xbf16>
    %c0_1 = arith.constant 0 : index
    %c0_2 = arith.constant 0 : index
    %1 = vector.load %arg3[%c0_1, %c0_2] : memref<128x128xbf16, #tpu.memory_space<vmem>>, vector<128x128xbf16>
    %cst = arith.constant dense<0.000000e+00> : vector<512x128xf32>
    %2 = tpu.matmul %0, %1, %cst {dimension_numbers = #tpu.dot_dimension_numbers<[1], [0], [0], [1], [0, 0, 1, 1], [], []>} : vector<512x128xbf16>, vector<128x128xbf16>, vector<512x128xf32> -> vector<512x128xf32>
    %c0_3 = arith.constant 0 : index
    %c0_4 = arith.constant 0 : index
    %3 = vector.load %arg4[%c0_3, %c0_4] : memref<1x128xf32, #tpu.memory_space<vmem>>, vector<1x128xf32>
    %4 = vector.broadcast %3 : vector<1x128xf32> to vector<512x128xf32>
    %5 = arith.addf %2, %4 : vector<512x128xf32>
    %6 = arith.truncf %5 : vector<512x128xf32> to vector<512x128xbf16>
    %c0_5 = arith.constant 0 : index
    %c0_6 = arith.constant 0 : index
    %7 = vector.load %arg5[%c0_5, %c0_6] : memref<512x128xbf16, #tpu.memory_space<vmem>>, vector<512x128xbf16>
    tpu.vector_store %arg5[%c0_5, %c0_6], %6 {strides = array<i32>} : memref<512x128xbf16, #tpu.memory_space<vmem>>, vector<512x128xbf16>,
    return
  }
  func.func @transform_0(%arg0: i32, %arg1: i32) -> (i32, i32) {
    %c0_i32 = arith.constant 0 : i32
    %c0_i32_0 = arith.constant 0 : i32
    return %arg0, %c0_i32 : i32, i32
  }
  func.func @transform_1(%arg0: i32, %arg1: i32) -> (i32, i32) {
    %c0_i32 = arith.constant 0 : i32
    %c0_i32_0 = arith.constant 0 : i32
    return %c0_i32, %arg1 : i32, i32
  }
  func.func @transform_2(%arg0: i32, %arg1: i32) -> (i32, i32) {
    %c0_i32 = arith.constant 0 : i32
    %c0_i32_0 = arith.constant 0 : i32
    return %c0_i32, %arg1 : i32, i32
  }
  func.func @transform_3(%arg0: i32, %arg1: i32) -> (i32, i32) {
    %c0_i32 = arith.constant 0 : i32
    return %arg0, %arg1 : i32, i32
  }
}

</mosaic_0001>

<bundles_post_ra>
// kernel: tpu_custom_call.1
= control target key start
LH: loop header
LB: loop body
LE: loop exit
PB: predicated region body
PF: predicated region fallthrough
CT: control target
= control target key end

     0   :  { %8 = vsyncpa [#allocation3], 0  ;;  %s1299_s0 = inlined_call_operand.hbm [shape: bf16[512,128], index: 0, kind: input, shape index: {}]   ;;  %s1300_s1 = inlined_call_operand.hbm [shape: bf16[128,128], index: 1, kind: input, shape index: {}]   ;;  %s1301_s2 = inlined_call_operand.vmem [shape: f32[1,128], index: 2, kind: input, shape index: {}]   ;;  %s1302_s3 = inlined_call_operand.hbm [shape: bf16[512,128], index: 3, kind: output, shape index: {}]  }
   0x1   :  { %9 = vsyncpa [#allocation6], 0 }
   0x2   :  { %10 = vsyncpa [#allocation4], 0  ;;  %s15_s14 = sshll.u32 %s1299_s0, 4  ;;  %s1187_s15 = smov [#allocation2]   ;;  %s16_s14 = int_to_ptr.hbm [resolvable:$true] %s15_s14 }
   0x3   :  { %s17_s16 = sshll.u32 %s1187_s15, 4  ;;  %s28_s19 = sshll.u32 %s1300_s1, 4  ;;  %s18_s16 = int_to_ptr.vmem [resolvable:$true] %s17_s16  ;;  %s29_s19 = int_to_ptr.hbm [resolvable:$true] %s28_s19 }
   0x4   :  { %s1188_s20 = smov 64   ;;  %s1189_s21 = smov 4  }
   0x5   :  { %23 = dma.hbm_to_vmem [thread:$0]  %s16_s14, 4096, %s18_s16, [#allocation3], %s1188_s20, %s1188_s20, %s1189_s21  }
   0x6   :  { %s1190_s22 = smov [#allocation5]  }
   0x7   :  { %s30_s23 = sshll.u32 %s1190_s22, 4  ;;  %s31_s23 = int_to_ptr.vmem [resolvable:$true] %s30_s23 }
   0x8   :  { %36 = dma.hbm_to_vmem [thread:$0]  %s29_s19, 1024, %s31_s23, [#allocation6], %s1188_s20, %s1188_s20, %s1189_s21  }
   0x9   :  { %1181 = dma.done.wait [#allocation3], 4096  }
   0xa   :  { %1182 = vsyncadd [#allocation3], 4294963200 }
   0xb   :  { %1183 = dma.done.wait [#allocation6], 1024  }
   0xc   :  { %1184 = vsyncadd [#allocation6], 4294966272  ;;  %v887_v0 = vld [vmem:[#allocation5 + $0x38] sm:$0xff]  ;;  %v886_v1 = vld [vmem:[#allocation5 + $0x30] sm:$0xff]  ;;  %s674_s27 = sshll.u32 %s1302_s3, 4  ;;  %s675_s27 = int_to_ptr.hbm [resolvable:$true] %s674_s27 }
   0xd   :  { %371 = vmatpush.bf16.msra.mxu0 %v887_v0  ;;  %1079 = vmatpush.bf16.msra.mxu1 %v887_v0  ;;  %v885_v2 = vld [vmem:[#allocation5 + $0x28] sm:$0xff]  ;;  %v884_v3 = vld [vmem:[#allocation5 + $0x20] sm:$0xff]  ;;  %v883_v4 = vld [vmem:[#allocation5 + $0x18] sm:$0xff] }
   0xe   :  { %1080 = vmatpush.bf16.msra.mxu2 %v887_v0  ;;  %1081 = vmatpush.bf16.msra.mxu3 %v887_v0  ;;  %v882_v5 = vld [vmem:[#allocation5 + $0x10] sm:$0xff]  ;;  %v881_v6 = vld [vmem:[#allocation5 + $0x8] sm:$0xff]  ;;  %v880_v7 = vld [vmem:[#allocation5] sm:$0xff] }
   0xf   :  { %v848_v8 = vld [vmem:[#allocation2] sm:$0xff]  ;;  %v849_v12 = vld [vmem:[#allocation2 + $0x8] sm:$0xff]  ;;  %v850_v16 = vld [vmem:[#allocation2 + $0x10] sm:$0xff] }
  0x10   :  { %v856_v9 = vld [vmem:[#allocation2 + $0x40] sm:$0xff]  ;;  %v857_v13 = vld [vmem:[#allocation2 + $0x48] sm:$0xff]  ;;  %v858_v17 = vld [vmem:[#allocation2 + $0x50] sm:$0xff] }
  0x11   :  { %372 = vmatpush.bf16.msra.mxu0 %v886_v1  ;;  %1082 = vmatpush.bf16.msra.mxu1 %v886_v1  ;;  %v864_v10 = vld [vmem:[#allocation2 + $0x80] sm:$0xff]  ;;  %v865_v14 = vld [vmem:[#allocation2 + $0x88] sm:$0xff]  ;;  %v866_v18 = vld [vmem:[#allocation2 + $0x90] sm:$0xff] }
  0x12   :  { %1083 = vmatpush.bf16.msra.mxu2 %v886_v1  ;;  %1084 = vmatpush.bf16.msra.mxu3 %v886_v1  ;;  %v872_v11 = vld [vmem:[#allocation2 + $0xc0] sm:$0xff]  ;;  %v873_v15 = vld [vmem:[#allocation2 + $0xc8] sm:$0xff]  ;;  %v874_v19 = vld [vmem:[#allocation2 + $0xd0] sm:$0xff] }
  0x13   :  { %v851_v20 = vld [vmem:[#allocation2 + $0x18] sm:$0xff]  ;;  %v852_v24 = vld [vmem:[#allocation2 + $0x20] sm:$0xff]  ;;  %v853_v28 = vld [vmem:[#allocation2 + $0x28] sm:$0xff] }
  0x14   :  { %v859_v21 = vld [vmem:[#allocation2 + $0x58] sm:$0xff]  ;;  %v860_v25 = vld [vmem:[#allocation2 + $0x60] sm:$0xff]  ;;  %v861_v29 = vld [vmem:[#allocation2 + $0x68] sm:$0xff] }
  0x15   :  { %373 = vmatpush.bf16.msra.mxu0 %v885_v2  ;;  %1085 = vmatpush.bf16.msra.mxu1 %v885_v2  ;;  %v867_v22 = vld [vmem:[#allocation2 + $0x98] sm:$0xff]  ;;  %v868_v26 = vld [vmem:[#allocation2 + $0xa0] sm:$0xff]  ;;  %v869_v30 = vld [vmem:[#allocation2 + $0xa8] sm:$0xff] }
  0x16   :  { %1086 = vmatpush.bf16.msra.mxu2 %v885_v2  ;;  %1087 = vmatpush.bf16.msra.mxu3 %v885_v2  ;;  %v875_v23 = vld [vmem:[#allocation2 + $0xd8] sm:$0xff]  ;;  %v876_v27 = vld [vmem:[#allocation2 + $0xe0] sm:$0xff]  ;;  %v877_v31 = vld [vmem:[#allocation2 + $0xe8] sm:$0xff] }
  0x17   :  { %v854_v32 = vld [vmem:[#allocation2 + $0x30] sm:$0xff]  ;;  %v855_v36 = vld [vmem:[#allocation2 + $0x38] sm:$0xff]  ;;  %v1227_v42 = vld [vmem:[%s1301_s2] ss:$0 sm:$0xff]  ;;  %s1191_s2 = smov [#allocation7]  }
  0x18   :  { %v862_v33 = vld [vmem:[#allocation2 + $0x70] sm:$0xff]  ;;  %v863_v37 = vld [vmem:[#allocation2 + $0x78] sm:$0xff]  ;;  %s672_s24 = sshll.u32 %s1191_s2, 4  ;;  %s673_s24 = int_to_ptr.vmem [resolvable:$true] %s672_s24 }
  0x19   :  { %374 = vmatpush.bf16.msra.mxu0 %v884_v3  ;;  %1088 = vmatpush.bf16.msra.mxu1 %v884_v3  ;;  %v870_v34 = vld [vmem:[#allocation2 + $0xb0] sm:$0xff]  ;;  %v871_v38 = vld [vmem:[#allocation2 + $0xb8] sm:$0xff] }
  0x1a   :  { %1089 = vmatpush.bf16.msra.mxu2 %v884_v3  ;;  %1090 = vmatpush.bf16.msra.mxu3 %v884_v3  ;;  %v878_v35 = vld [vmem:[#allocation2 + $0xf0] sm:$0xff]  ;;  %v879_v39 = vld [vmem:[#allocation2 + $0xf8] sm:$0xff] }
  0x1d   :  { %375 = vmatpush.bf16.msra.mxu0 %v883_v4  ;;  %1091 = vmatpush.bf16.msra.mxu1 %v883_v4 }
  0x1e   :  { %1092 = vmatpush.bf16.msra.mxu2 %v883_v4  ;;  %1093 = vmatpush.bf16.msra.mxu3 %v883_v4 }
  0x21   :  { %376 = vmatpush.bf16.msra.mxu0 %v882_v5  ;;  %1094 = vmatpush.bf16.msra.mxu1 %v882_v5 }
  0x22   :  { %1095 = vmatpush.bf16.msra.mxu2 %v882_v5  ;;  %1096 = vmatpush.bf16.msra.mxu3 %v882_v5 }
  0x25   :  { %377 = vmatpush.bf16.msra.mxu0 %v881_v6  ;;  %1097 = vmatpush.bf16.msra.mxu1 %v881_v6 }
  0x26   :  { %1098 = vmatpush.bf16.msra.mxu2 %v881_v6  ;;  %1099 = vmatpush.bf16.msra.mxu3 %v881_v6 }
  0x29   :  { %378 = vmatpush.bf16.msra.mxu0 %v880_v7  ;;  %1100 = vmatpush.bf16.msra.mxu1 %v880_v7 }
  0x2a   :  { %1101 = vmatpush.bf16.msra.mxu2 %v880_v7  ;;  %1102 = vmatpush.bf16.msra.mxu3 %v880_v7 }
  0x2c   :  { %379 = vmatmul.bf16.vlgmr.msra.gmra.mxu0 %v848_v8  ;;  %419 = vmatmul.bf16.vlgmr.msra.gmra.mxu1 %v856_v9 }
  0x2d   :  { %459 = vmatmul.bf16.vlgmr.msra.gmra.mxu2 %v864_v10  ;;  %499 = vmatmul.bf16.vlgmr.msra.gmra.mxu3 %v872_v11 }
  0x3c   :  { %384 = vmatmul.bf16.gmra.mxu0 %v849_v12  ;;  %424 = vmatmul.bf16.gmra.mxu1 %v857_v13 }
  0x3d   :  { %464 = vmatmul.bf16.gmra.mxu2 %v865_v14  ;;  %504 = vmatmul.bf16.gmra.mxu3 %v873_v15 }
  0x4c   :  { %389 = vmatmul.bf16.gmra.mxu0 %v850_v16  ;;  %429 = vmatmul.bf16.gmra.mxu1 %v858_v17 }
  0x4d   :  { %469 = vmatmul.bf16.gmra.mxu2 %v866_v18  ;;  %509 = vmatmul.bf16.gmra.mxu3 %v874_v19 }
  0x5c   :  { %394 = vmatmul.bf16.gmra.mxu0 %v851_v20  ;;  %434 = vmatmul.bf16.gmra.mxu1 %v859_v21 }
  0x5d   :  { %474 = vmatmul.bf16.gmra.mxu2 %v867_v22  ;;  %514 = vmatmul.bf16.gmra.mxu3 %v875_v23 }
  0x6c   :  { %399 = vmatmul.bf16.gmra.mxu0 %v852_v24  ;;  %439 = vmatmul.bf16.gmra.mxu1 %v860_v25 }
  0x6d   :  { %479 = vmatmul.bf16.gmra.mxu2 %v868_v26  ;;  %519 = vmatmul.bf16.gmra.mxu3 %v876_v27 }
  0x7c   :  { %404 = vmatmul.bf16.gmra.mxu0 %v853_v28  ;;  %444 = vmatmul.bf16.gmra.mxu1 %v861_v29 }
  0x7d   :  { %484 = vmatmul.bf16.gmra.mxu2 %v869_v30  ;;  %524 = vmatmul.bf16.gmra.mxu3 %v877_v31 }
  0x8c   :  { %409 = vmatmul.bf16.gmra.mxu0 %v854_v32  ;;  %449 = vmatmul.bf16.gmra.mxu1 %v862_v33 }
  0x8d   :  { %489 = vmatmul.bf16.gmra.mxu2 %v870_v34  ;;  %529 = vmatmul.bf16.gmra.mxu3 %v878_v35 }
  0x9c   :  { %414 = vmatmul.bf16.gmra.mxu0 %v855_v36  ;;  %454 = vmatmul.bf16.gmra.mxu1 %v863_v37 }
  0x9d   :  { %494 = vmatmul.bf16.gmra.mxu2 %v871_v38  ;;  %534 = vmatmul.bf16.gmra.mxu3 %v879_v39 }
  0xa9   :  { %v380_v40 = vpop.f32.mrf.mxu0  ;;  %v420_v41 = vpop.f32.mrf.mxu1 }
  0xaa   :  { %v381_v47 = vadd.f32 %v1227_v42, %v380_v40  ;;  %v421_v48 = vadd.f32 %v1227_v42, %v420_v41 }
  0xb0   :  { %v460_v43 = vpop.f32.mrf.mxu2  ;;  %v500_v44 = vpop.f32.mrf.mxu3 }
  0xb1   :  { %v382_v45 = vpop.f32.mrf.mxu0  ;;  %v422_v46 = vpop.f32.mrf.mxu1  ;;  %v461_v55 = vadd.f32 %v1227_v42, %v460_v43  ;;  %v501_v56 = vadd.f32 %v1227_v42, %v500_v44 }
  0xb2   :  { %v383_v49 = vadd.f32 %v1227_v42, %v382_v45  ;;  %v423_v50 = vadd.f32 %v1227_v42, %v422_v46 }
  0xb4   :  { %v891_v51 = vpack.c.bf16 %v383_v49, %v381_v47  ;;  %v931_v52 = vpack.c.bf16 %v423_v50, %v421_v48 }
  0xb6   :  { %892 = vst [vmem:[#allocation7] sm:$0xff] %v891_v51  }
  0xb7   :  { %1055 = vst [vmem:[#allocation7 + $0x40] sm:$0xff] %v931_v52  }
  0xb8   :  { %v462_v53 = vpop.f32.mrf.mxu2  ;;  %v502_v54 = vpop.f32.mrf.mxu3 }
  0xb9   :  { %v463_v57 = vadd.f32 %v1227_v42, %v462_v53  ;;  %v503_v58 = vadd.f32 %v1227_v42, %v502_v54  ;;  %v385_v59 = vpop.f32.mrf.mxu0  ;;  %v425_v60 = vpop.f32.mrf.mxu1 }
  0xba   :  { %v386_v3 = vadd.f32 %v1227_v42, %v385_v59  ;;  %v426_v4 = vadd.f32 %v1227_v42, %v425_v60 }
  0xbb   :  { %v971_v61 = vpack.c.bf16 %v463_v57, %v461_v55  ;;  %v1011_v62 = vpack.c.bf16 %v503_v58, %v501_v56 }
  0xbd   :  { %1063 = vst [vmem:[#allocation7 + $0x80] sm:$0xff] %v971_v61  }
  0xbe   :  { %1071 = vst [vmem:[#allocation7 + $0xc0] sm:$0xff] %v1011_v62  }
  0xc0   :  { %v465_v63 = vpop.f32.mrf.mxu2  ;;  %v505_v0 = vpop.f32.mrf.mxu3 }
  0xc1   :  { %v387_v1 = vpop.f32.mrf.mxu0  ;;  %v427_v2 = vpop.f32.mrf.mxu1  ;;  %v466_v11 = vadd.f32 %v1227_v42, %v465_v63  ;;  %v506_v12 = vadd.f32 %v1227_v42, %v505_v0 }
  0xc2   :  { %v388_v5 = vadd.f32 %v1227_v42, %v387_v1  ;;  %v428_v6 = vadd.f32 %v1227_v42, %v427_v2 }
  0xc4   :  { %v896_v7 = vpack.c.bf16 %v388_v5, %v386_v3  ;;  %v936_v8 = vpack.c.bf16 %v428_v6, %v426_v4 }
  0xc6   :  { %1048 = vst [vmem:[#allocation7 + $0x8] sm:$0xff] %v896_v7  }
  0xc7   :  { %1056 = vst [vmem:[#allocation7 + $0x48] sm:$0xff] %v936_v8  }
  0xc8   :  { %v467_v9 = vpop.f32.mrf.mxu2  ;;  %v507_v10 = vpop.f32.mrf.mxu3 }
  0xc9   :  { %v468_v13 = vadd.f32 %v1227_v42, %v467_v9  ;;  %v508_v14 = vadd.f32 %v1227_v42, %v507_v10  ;;  %v390_v15 = vpop.f32.mrf.mxu0  ;;  %v430_v16 = vpop.f32.mrf.mxu1 }
  0xca   :  { %v391_v23 = vadd.f32 %v1227_v42, %v390_v15  ;;  %v431_v24 = vadd.f32 %v1227_v42, %v430_v16 }
  0xcb   :  { %v976_v17 = vpack.c.bf16 %v468_v13, %v466_v11  ;;  %v1016_v18 = vpack.c.bf16 %v508_v14, %v506_v12 }
  0xcd   :  { %1064 = vst [vmem:[#allocation7 + $0x88] sm:$0xff] %v976_v17  }
  0xce   :  { %1072 = vst [vmem:[#allocation7 + $0xc8] sm:$0xff] %v1016_v18  }
  0xd0   :  { %v470_v19 = vpop.f32.mrf.mxu2  ;;  %v510_v20 = vpop.f32.mrf.mxu3 }
  0xd1   :  { %v392_v21 = vpop.f32.mrf.mxu0  ;;  %v432_v22 = vpop.f32.mrf.mxu1  ;;  %v471_v31 = vadd.f32 %v1227_v42, %v470_v19  ;;  %v511_v32 = vadd.f32 %v1227_v42, %v510_v20 }
  0xd2   :  { %v393_v25 = vadd.f32 %v1227_v42, %v392_v21  ;;  %v433_v26 = vadd.f32 %v1227_v42, %v432_v22 }
  0xd4   :  { %v901_v27 = vpack.c.bf16 %v393_v25, %v391_v23  ;;  %v941_v28 = vpack.c.bf16 %v433_v26, %v431_v24 }
  0xd6   :  { %1049 = vst [vmem:[#allocation7 + $0x10] sm:$0xff] %v901_v27  }
  0xd7   :  { %1057 = vst [vmem:[#allocation7 + $0x50] sm:$0xff] %v941_v28  }
  0xd8   :  { %v472_v29 = vpop.f32.mrf.mxu2  ;;  %v512_v30 = vpop.f32.mrf.mxu3 }
  0xd9   :  { %v473_v33 = vadd.f32 %v1227_v42, %v472_v29  ;;  %v513_v34 = vadd.f32 %v1227_v42, %v512_v30  ;;  %v395_v35 = vpop.f32.mrf.mxu0  ;;  %v435_v36 = vpop.f32.mrf.mxu1 }
  0xda   :  { %v396_v44 = vadd.f32 %v1227_v42, %v395_v35  ;;  %v436_v45 = vadd.f32 %v1227_v42, %v435_v36 }
  0xdb   :  { %v981_v37 = vpack.c.bf16 %v473_v33, %v471_v31  ;;  %v1021_v38 = vpack.c.bf16 %v513_v34, %v511_v32 }
  0xdd   :  { %1065 = vst [vmem:[#allocation7 + $0x90] sm:$0xff] %v981_v37  }
  0xde   :  { %1073 = vst [vmem:[#allocation7 + $0xd0] sm:$0xff] %v1021_v38  }
  0xe0   :  { %v475_v39 = vpop.f32.mrf.mxu2  ;;  %v515_v40 = vpop.f32.mrf.mxu3 }
  0xe1   :  { %v397_v41 = vpop.f32.mrf.mxu0  ;;  %v437_v43 = vpop.f32.mrf.mxu1  ;;  %v476_v52 = vadd.f32 %v1227_v42, %v475_v39  ;;  %v516_v53 = vadd.f32 %v1227_v42, %v515_v40 }
  0xe2   :  { %v398_v46 = vadd.f32 %v1227_v42, %v397_v41  ;;  %v438_v47 = vadd.f32 %v1227_v42, %v437_v43 }
  0xe4   :  { %v906_v48 = vpack.c.bf16 %v398_v46, %v396_v44  ;;  %v946_v49 = vpack.c.bf16 %v438_v47, %v436_v45 }
  0xe6   :  { %1050 = vst [vmem:[#allocation7 + $0x18] sm:$0xff] %v906_v48  }
  0xe7   :  { %1058 = vst [vmem:[#allocation7 + $0x58] sm:$0xff] %v946_v49  }
  0xe8   :  { %v477_v50 = vpop.f32.mrf.mxu2  ;;  %v517_v51 = vpop.f32.mrf.mxu3 }
  0xe9   :  { %v478_v54 = vadd.f32 %v1227_v42, %v477_v50  ;;  %v518_v55 = vadd.f32 %v1227_v42, %v517_v51  ;;  %v400_v56 = vpop.f32.mrf.mxu0  ;;  %v440_v57 = vpop.f32.mrf.mxu1 }
  0xea   :  { %v401_v0 = vadd.f32 %v1227_v42, %v400_v56  ;;  %v441_v1 = vadd.f32 %v1227_v42, %v440_v57 }
  0xeb   :  { %v986_v58 = vpack.c.bf16 %v478_v54, %v476_v52  ;;  %v1026_v59 = vpack.c.bf16 %v518_v55, %v516_v53 }
  0xed   :  { %1066 = vst [vmem:[#allocation7 + $0x98] sm:$0xff] %v986_v58  }
  0xee   :  { %1074 = vst [vmem:[#allocation7 + $0xd8] sm:$0xff] %v1026_v59  }
  0xf0   :  { %v480_v60 = vpop.f32.mrf.mxu2  ;;  %v520_v61 = vpop.f32.mrf.mxu3 }
  0xf1   :  { %v402_v62 = vpop.f32.mrf.mxu0  ;;  %v442_v63 = vpop.f32.mrf.mxu1  ;;  %v481_v8 = vadd.f32 %v1227_v42, %v480_v60  ;;  %v521_v9 = vadd.f32 %v1227_v42, %v520_v61 }
  0xf2   :  { %v403_v2 = vadd.f32 %v1227_v42, %v402_v62  ;;  %v443_v3 = vadd.f32 %v1227_v42, %v442_v63 }
  0xf4   :  { %v911_v4 = vpack.c.bf16 %v403_v2, %v401_v0  ;;  %v951_v5 = vpack.c.bf16 %v443_v3, %v441_v1 }
  0xf6   :  { %1051 = vst [vmem:[#allocation7 + $0x20] sm:$0xff] %v911_v4  }
  0xf7   :  { %1059 = vst [vmem:[#allocation7 + $0x60] sm:$0xff] %v951_v5  }
  0xf8   :  { %v482_v6 = vpop.f32.mrf.mxu2  ;;  %v522_v7 = vpop.f32.mrf.mxu3 }
  0xf9   :  { %v483_v10 = vadd.f32 %v1227_v42, %v482_v6  ;;  %v523_v11 = vadd.f32 %v1227_v42, %v522_v7  ;;  %v405_v12 = vpop.f32.mrf.mxu0  ;;  %v445_v13 = vpop.f32.mrf.mxu1 }
  0xfa   :  { %v406_v20 = vadd.f32 %v1227_v42, %v405_v12  ;;  %v446_v21 = vadd.f32 %v1227_v42, %v445_v13 }
  0xfb   :  { %v991_v14 = vpack.c.bf16 %v483_v10, %v481_v8  ;;  %v1031_v15 = vpack.c.bf16 %v523_v11, %v521_v9 }
  0xfd   :  { %1067 = vst [vmem:[#allocation7 + $0xa0] sm:$0xff] %v991_v14  }
  0xfe   :  { %1075 = vst [vmem:[#allocation7 + $0xe0] sm:$0xff] %v1031_v15  }
 0x100   :  { %v485_v16 = vpop.f32.mrf.mxu2  ;;  %v525_v17 = vpop.f32.mrf.mxu3 }
 0x101   :  { %v407_v18 = vpop.f32.mrf.mxu0  ;;  %v447_v19 = vpop.f32.mrf.mxu1  ;;  %v486_v28 = vadd.f32 %v1227_v42, %v485_v16  ;;  %v526_v29 = vadd.f32 %v1227_v42, %v525_v17 }
 0x102   :  { %v408_v22 = vadd.f32 %v1227_v42, %v407_v18  ;;  %v448_v23 = vadd.f32 %v1227_v42, %v447_v19 }
 0x104   :  { %v916_v24 = vpack.c.bf16 %v408_v22, %v406_v20  ;;  %v956_v25 = vpack.c.bf16 %v448_v23, %v446_v21 }
 0x106   :  { %1052 = vst [vmem:[#allocation7 + $0x28] sm:$0xff] %v916_v24  }
 0x107   :  { %1060 = vst [vmem:[#allocation7 + $0x68] sm:$0xff] %v956_v25  }
 0x108   :  { %v487_v26 = vpop.f32.mrf.mxu2  ;;  %v527_v27 = vpop.f32.mrf.mxu3 }
 0x109   :  { %v488_v30 = vadd.f32 %v1227_v42, %v487_v26  ;;  %v528_v31 = vadd.f32 %v1227_v42, %v527_v27  ;;  %v410_v32 = vpop.f32.mrf.mxu0  ;;  %v450_v33 = vpop.f32.mrf.mxu1 }
 0x10a   :  { %v411_v40 = vadd.f32 %v1227_v42, %v410_v32  ;;  %v451_v41 = vadd.f32 %v1227_v42, %v450_v33 }
 0x10b   :  { %v996_v34 = vpack.c.bf16 %v488_v30, %v486_v28  ;;  %v1036_v35 = vpack.c.bf16 %v528_v31, %v526_v29 }
 0x10d   :  { %1068 = vst [vmem:[#allocation7 + $0xa8] sm:$0xff] %v996_v34  }
 0x10e   :  { %1076 = vst [vmem:[#allocation7 + $0xe8] sm:$0xff] %v1036_v35  }
 0x110   :  { %v490_v36 = vpop.f32.mrf.mxu2  ;;  %v530_v37 = vpop.f32.mrf.mxu3 }
 0x111   :  { %v412_v38 = vpop.f32.mrf.mxu0  ;;  %v452_v39 = vpop.f32.mrf.mxu1  ;;  %v491_v49 = vadd.f32 %v1227_v42, %v490_v36  ;;  %v531_v50 = vadd.f32 %v1227_v42, %v530_v37 }
 0x112   :  { %v413_v43 = vadd.f32 %v1227_v42, %v412_v38  ;;  %v453_v44 = vadd.f32 %v1227_v42, %v452_v39 }
 0x114   :  { %v921_v45 = vpack.c.bf16 %v413_v43, %v411_v40  ;;  %v961_v46 = vpack.c.bf16 %v453_v44, %v451_v41 }
 0x116   :  { %1053 = vst [vmem:[#allocation7 + $0x30] sm:$0xff] %v921_v45  }
 0x117   :  { %1061 = vst [vmem:[#allocation7 + $0x70] sm:$0xff] %v961_v46  }
 0x118   :  { %v492_v47 = vpop.f32.mrf.mxu2  ;;  %v532_v48 = vpop.f32.mrf.mxu3 }
 0x119   :  { %v493_v51 = vadd.f32 %v1227_v42, %v492_v47  ;;  %v533_v52 = vadd.f32 %v1227_v42, %v532_v48  ;;  %v415_v53 = vpop.f32.mrf.mxu0  ;;  %v455_v54 = vpop.f32.mrf.mxu1 }
 0x11a   :  { %v416_v61 = vadd.f32 %v1227_v42, %v415_v53  ;;  %v456_v62 = vadd.f32 %v1227_v42, %v455_v54 }
 0x11b   :  { %v1001_v55 = vpack.c.bf16 %v493_v51, %v491_v49  ;;  %v1041_v56 = vpack.c.bf16 %v533_v52, %v531_v50 }
 0x11d   :  { %1069 = vst [vmem:[#allocation7 + $0xb0] sm:$0xff] %v1001_v55  }
 0x11e   :  { %1077 = vst [vmem:[#allocation7 + $0xf0] sm:$0xff] %v1041_v56  }
 0x120   :  { %v495_v57 = vpop.f32.mrf.mxu2  ;;  %v535_v58 = vpop.f32.mrf.mxu3 }
 0x121   :  { %v417_v59 = vpop.f32.mrf.mxu0  ;;  %v457_v60 = vpop.f32.mrf.mxu1  ;;  %v496_v5 = vadd.f32 %v1227_v42, %v495_v57  ;;  %v536_v6 = vadd.f32 %v1227_v42, %v535_v58 }
 0x122   :  { %v418_v63 = vadd.f32 %v1227_v42, %v417_v59  ;;  %v458_v0 = vadd.f32 %v1227_v42, %v457_v60 }
 0x124   :  { %v926_v1 = vpack.c.bf16 %v418_v63, %v416_v61  ;;  %v966_v2 = vpack.c.bf16 %v458_v0, %v456_v62 }
 0x126   :  { %1054 = vst [vmem:[#allocation7 + $0x38] sm:$0xff] %v926_v1  }
 0x127   :  { %1062 = vst [vmem:[#allocation7 + $0x78] sm:$0xff] %v966_v2  }
 0x128   :  { %v497_v3 = vpop.f32.mrf.mxu2  ;;  %v537_v4 = vpop.f32.mrf.mxu3 }
 0x129   :  { %v498_v7 = vadd.f32 %v1227_v42, %v497_v3  ;;  %v538_v8 = vadd.f32 %v1227_v42, %v537_v4 }
 0x12b   :  { %v1006_v9 = vpack.c.bf16 %v498_v7, %v496_v5  ;;  %v1046_v10 = vpack.c.bf16 %v538_v8, %v536_v6 }
 0x12d   :  { %1070 = vst [vmem:[#allocation7 + $0xb8] sm:$0xff] %v1006_v9  }
 0x12e   :  { %1078 = vst [vmem:[#allocation7 + $0xf8] sm:$0xff] %v1046_v10  }
 0x12f   :  { %680 = dma.vmem_to_hbm [thread:$0]  %s673_s24, 4096, %s675_s27, [#allocation4], %s1188_s20, %s1188_s20, %s1189_s21  }
 0x130   :  { %1185 = dma.done.wait [#allocation4], 4096  }
 0x131   :  { %1186 = vsyncadd [#allocation4], 4294963200 }
 0x132   :  { %685 = vsyncpa [#allocation3], 1 }
 0x133   :  { %686 = vsyncpa [#allocation6], 1 }
 0x134   :  { %687 = vsyncpa [#allocation4], 1 }

</bundles_post_ra>
